<compile_context>
chip_gen: v7x
topology: tpu7x:2x2x1
jax: 0.10.0
libtpu: 0.0.40
codegen_flags: <defaults>
</compile_context>

<pallas_src>
import functools

import jax
import jax.numpy as jnp
from jax import lax
from jax.experimental import pallas as pl
from jax.experimental.pallas import tpu as pltpu


# ----------------------------- Pallas kernel ------------------------------- #
def _gcc_kernel(x_ref, circ_ref, peb_ref, o_ref, *, is_h):
    """One (channel-block, batch-element) step, directly in NCHW layout.

    x_ref   : (Cb, H, W)  input block (batch dim squeezed), x.dtype
    circ_ref: (Cb, L, L)  per-channel circulant ('H': [i, m] ; 'W': [m, i]), x.dtype
    peb_ref : (Cb, L, 1) ('H') or (Cb, 1, L) ('W')  folded pe+bias, f32
    o_ref   : (Cb, H, W)  output block, stored straight back in NCHW
    """
    if is_h:
        # out[c, i, w] = sum_m circ[c, i, m] * x[c, m, w]
        y = lax.dot_general(
            circ_ref[...], x_ref[...],
            dimension_numbers=(((2,), (1,)), ((0,), (0,))),
            preferred_element_type=jnp.float32,
        )
    else:
        # out[c, h, i] = sum_m x[c, h, m] * circ[c, m, i]
        y = lax.dot_general(
            x_ref[...], circ_ref[...],
            dimension_numbers=(((2,), (1,)), ((0,), (0,))),
            preferred_element_type=jnp.float32,
        )
    o_ref[...] = (y + peb_ref[...]).astype(o_ref.dtype)


# ----------------------------- JAX glue ------------------------------------ #
def linear_interp_align_corners(v, out_size):
    """1-D linear interpolation along the last axis, align_corners=True.

    Matches F.interpolate(..., mode='bilinear', align_corners=True) applied
    separably along one spatial axis.
    """
    L = v.shape[-1]
    if L == 1:
        return jnp.broadcast_to(v, v.shape[:-1] + (out_size,))
    if out_size == 1:
        return v[..., :1]
    pos = jnp.arange(out_size, dtype=jnp.float32) * ((L - 1) / (out_size - 1))
    lo = jnp.floor(pos).astype(jnp.int32)
    hi = jnp.minimum(lo + 1, L - 1)
    frac = (pos - lo.astype(jnp.float32)).astype(v.dtype)
    return v[..., lo] * (1.0 - frac) + v[..., hi] * frac


def _round_up(a, b):
    return -(-a // b) * b


def _pick_channel_block(C, N, H, W, L, itemsize):
    """Pick Cb (divisor of C) so the true per-step VMEM footprint (including
    lane/sublane padding and the f32 accumulator) stays under a conservative
    budget that fits v7x's 64 MiB VMEM, preferring an even grid extent >= 4
    so both v7x TensorCores get work and the double-buffer pipeline can hide
    prologue/epilogue DMA on single-TC chips."""
    sub = 16 if itemsize == 2 else 8      # sublane granularity for packed dtypes

    def per_step(cb):
        x_blk = cb * _round_up(H, sub) * _round_up(W, 128) * itemsize   # input
        o_blk = x_blk                                                   # output
        circ = cb * _round_up(L, sub) * _round_up(L, 128) * itemsize    # circulant
        peb = cb * _round_up(L, 8) * 128 * 4                            # folded bias (lane-padded)
        acc = cb * _round_up(H, 8) * _round_up(W, 128) * 4              # f32 accumulator temp
        return 2 * (x_blk + o_blk + circ + peb) + acc                   # x2 = double buffering

    budget = 16 << 20
    divisors = [d for d in range(1, C + 1) if C % d == 0]
    fits = [d for d in divisors if per_step(d) <= budget]
    if not fits:
        # TODO(synk): for huge H*W a single channel may exceed the budget;
        # split the non-conv spatial axis into sub-blocks in that case.
        return 1, per_step(1)

    def ext(d):
        return (C // d) * N

    pref = [d for d in fits if ext(d) >= 4 and ext(d) % 2 == 0]
    if not pref:
        pref = [d for d in fits if ext(d) >= 2]
    if not pref:
        pref = fits
    cb = max(pref)
    return cb, per_step(cb)


def gcc_conv_forward(x, weight, bias, pe, type_):
    """Forward pass equivalent to GCC_conv.forward (instance_kernel_method =
    'interpolation_bilinear', use_pe=True when pe is not None)."""
    N, C, H, W = x.shape
    is_h = type_ == "H"
    L = H if is_h else W
    itemsize = jnp.dtype(x.dtype).itemsize

    # --- instance kernel: (C,1,K,1)/(C,1,1,K) -> (C, L) via bilinear interp ---
    w1d = weight.reshape(C, -1).astype(jnp.float32)
    w_inst = linear_interp_align_corners(w1d, L)           # (C, L)

    # --- circulant, oriented so the in-kernel dot needs no relayout ----------
    # 'H': circ[c, i, m] = w[c, (m-i)%L]   (lhs of the batched matmul)
    # 'W': circ[c, m, i] = w[c, (m-i)%L]   (rhs of the batched matmul)
    ar = jnp.arange(L)
    if is_h:
        idx = (ar[None, :] - ar[:, None]) % L              # [i, m]
    else:
        idx = (ar[:, None] - ar[None, :]) % L              # [m, i]
    circ_f32 = w_inst[:, idx]                              # (C, L, L) f32
    circ = circ_f32.astype(x.dtype)
    # TODO(synk): circ could be built in-kernel from the (C, L) weight row via
    # pltpu.roll to cut its HBM footprint by L; it is already read only once
    # per channel block, so the win is modest.

    # --- fold PE (1-D profile along the conv axis) and conv bias -------------
    # M @ (x + pe_bcast) + b  ==  M @ x + (M @ pe_1d + b)
    if pe is not None:
        pe1d = pe.reshape(C, -1).astype(jnp.float32)
        pe_l = linear_interp_align_corners(pe1d, L)        # (C, L)
        if is_h:
            peb = jnp.einsum("cim,cm->ci", circ_f32, pe_l) + bias[:, None]
        else:
            peb = jnp.einsum("cmi,cm->ci", circ_f32, pe_l) + bias[:, None]
    else:
        peb = jnp.broadcast_to(bias[:, None], (C, L))
    peb = peb.astype(jnp.float32)
    peb3 = peb.reshape(C, L, 1) if is_h else peb.reshape(C, 1, L)

    # --- tiling ---------------------------------------------------------------
    Cb, per_step_bytes = _pick_channel_block(C, N, H, W, L, itemsize)
    grid = (C // Cb, N)
    vmem_limit = max(32 << 20, per_step_bytes + (8 << 20))

    cost = pl.CostEstimate(
        flops=2 * N * C * H * W * L,
        transcendentals=0,
        bytes_accessed=2 * N * C * H * W * itemsize + C * L * L * itemsize + C * L * 4,
    )

    kernel = functools.partial(_gcc_kernel, is_h=is_h)

    out = pl.pallas_call(
        kernel,
        out_shape=jax.ShapeDtypeStruct((N, C, H, W), x.dtype),
        grid_spec=pltpu.PrefetchScalarGridSpec(
            num_scalar_prefetch=0,
            grid=grid,
            in_specs=[
                # x: NCHW block, batch dim squeezed -> (Cb, H, W) in the kernel.
                pl.BlockSpec((None, Cb, H, W), lambda c, n: (n, c, 0, 0)),
                # circulant: depends only on the channel block -> resident
                # across the inner n axis (fetched once per channel block).
                pl.BlockSpec((Cb, L, L), lambda c, n: (c, 0, 0)),
                # folded pe + bias.
                pl.BlockSpec(
                    (Cb, L, 1) if is_h else (Cb, 1, L),
                    lambda c, n: (c, 0, 0),
                ),
            ],
            # output written straight back in NCHW — no wrapper transpose.
            out_specs=pl.BlockSpec((None, Cb, H, W), lambda c, n: (n, c, 0, 0)),
        ),
        compiler_params=pltpu.CompilerParams(
            dimension_semantics=("parallel", "arbitrary"),
            vmem_limit_bytes=vmem_limit,
        ),
        cost_estimate=cost,
    )(x, circ, peb3)
    return out


# ------------------- deterministic parameter construction ------------------ #
class GCCConvPallas:
    def __init__(self, dim, type_, global_kernel_size, use_pe=True, key=None):
        assert type_ in ("H", "W")
        self.type = type_
        self.dim = dim
        self.global_kernel_size = global_kernel_size
        k1, k2, k3 = jax.random.split(key, 3)
        # depthwise Conv2d(dim, dim, kernel_size, groups=dim) weight / bias
        wshape = (
            (dim, 1, global_kernel_size, 1)
            if type_ == "H"
            else (dim, 1, 1, global_kernel_size)
        )
        fan_in = global_kernel_size  # (in_ch/groups) * kh * kw = 1 * K
        bound = 1.0 / (fan_in ** 0.5)
        self.weight = jax.random.uniform(k1, wshape, jnp.float32, -bound, bound)
        self.bias = jax.random.uniform(k2, (dim,), jnp.float32, -bound, bound)
        if use_pe:
            pe_shape = (
                (1, dim, global_kernel_size, 1)
                if type_ == "H"
                else (1, dim, 1, global_kernel_size)
            )
            # trunc_normal_(std=0.02)
            self.pe = 0.02 * jax.random.truncated_normal(
                k3, -2.0, 2.0, pe_shape, jnp.float32
            )
        else:
            self.pe = None

    def __call__(self, x):
        return gcc_conv_forward(x, self.weight, self.bias, self.pe, self.type)


# --------------------------- pure-JAX reference ---------------------------- #
def reference_forward(x, weight, bias, pe, type_):
    """Literal translation of the PyTorch forward (concat + grouped conv)."""
    N, C, H, W = x.shape
    is_h = type_ == "H"
    L = H if is_h else W
    w1d = weight.reshape(C, -1)
    w_inst = linear_interp_align_corners(w1d, L)  # (C, L)
    if pe is not None:
        pe1d = pe.reshape(C, -1)
        if is_h:
            pe_full = jnp.broadcast_to(
                linear_interp_align_corners(pe1d, H)[:, :, None], (C, H, W)
            )
        else:
            pe_full = jnp.broadcast_to(
                linear_interp_align_corners(pe1d, W)[:, None, :], (C, H, W)
            )
        x = x + pe_full[None]
    if is_h:
        x_cat = jnp.concatenate([x, x[:, :, :-1, :]], axis=2)
        w4 = w_inst[:, None, :, None]  # (C, 1, H, 1)
    else:
        x_cat = jnp.concatenate([x, x[:, :, :, :-1]], axis=3)
        w4 = w_inst[:, None, None, :]  # (C, 1, 1, W)
    out = lax.conv_general_dilated(
        x_cat,
        w4,
        window_strides=(1, 1),
        padding="VALID",
        dimension_numbers=("NCHW", "OIHW", "NCHW"),
        feature_group_count=C,
    )
    return out + bias[None, :, None, None]


# --------------------------------- demo ------------------------------------ #
if __name__ == "__main__":
    key = jax.random.PRNGKey(0)
    kx, kp = jax.random.split(key)

    N, dim, H, W = 2, 8, 16, 16
    global_kernel_size = 16  # typical GCC setting: kernel == feature size

    x = jax.random.normal(kx, (N, dim, H, W), jnp.float32)

    for t in ("H", "W"):
        mod = GCCConvPallas(dim, t, global_kernel_size, use_pe=True, key=kp)
        out = mod(x)
        out = jax.block_until_ready(out)
        ref = reference_forward(x, mod.weight, mod.bias, mod.pe, t)
        assert out.shape == (N, dim, H, W)
        # f32 MXU operands with f32 accumulation -> tight tolerance.
        assert jnp.allclose(out, ref, atol=1e-3, rtol=1e-3), f"mismatch for type {t}"

    print("KERNEL_OK")
</pallas_src>

<mosaic_0001>
module attributes {stable_mosaic.version = 11 : i64} {
  func.func @_gcc_kernel(%arg0: i32, %arg1: i32, %arg2: memref<1x4x16x16xf32, #tpu.memory_space<vmem>>, %arg3: memref<4x16x16xf32, #tpu.memory_space<vmem>>, %arg4: memref<4x16x1xf32, #tpu.memory_space<vmem>>, %arg5: memref<1x4x16x16xf32, #tpu.memory_space<vmem>>) attributes {dimension_semantics = [#tpu.dimension_semantics<parallel>, #tpu.dimension_semantics<arbitrary>], iteration_bounds = array<i64: 2, 2>, scalar_prefetch = 0 : i64, scratch_operands = 0 : i64, tpu.core_type = #tpu.core_type<tc>, window_params = [{transform_indices = @transform_0, window_bounds = array<i64: 1, 4, 16, 16>}, {transform_indices = @transform_1, window_bounds = array<i64: 4, 16, 16>}, {transform_indices = @transform_2, window_bounds = array<i64: 4, 16, 1>}, {transform_indices = @transform_3, window_bounds = array<i64: 1, 4, 16, 16>}]} {
    %c0 = arith.constant 0 : index
    %c0_0 = arith.constant 0 : index
    %c0_1 = arith.constant 0 : index
    %0 = vector.load %arg3[%c0, %c0_0, %c0_1] : memref<4x16x16xf32, #tpu.memory_space<vmem>>, vector<4x16x16xf32>
    %c0_2 = arith.constant 0 : index
    %c0_3 = arith.constant 0 : index
    %c0_4 = arith.constant 0 : index
    %c0_5 = arith.constant 0 : index
    %1 = vector.load %arg2[%c0_2, %c0_3, %c0_4, %c0_5] : memref<1x4x16x16xf32, #tpu.memory_space<vmem>>, vector<1x4x16x16xf32>
    %2 = vector.shape_cast %1 : vector<1x4x16x16xf32> to vector<4x16x16xf32>
    %cst = arith.constant dense<0.000000e+00> : vector<4x16x16xf32>
    %3 = tpu.matmul %0, %2, %cst {dimension_numbers = #tpu.dot_dimension_numbers<[2], [1], [1], [2], [0, 0, 0, 1, 1, 2], [0], [0]>} : vector<4x16x16xf32>, vector<4x16x16xf32>, vector<4x16x16xf32> -> vector<4x16x16xf32>
    %c0_6 = arith.constant 0 : index
    %c0_7 = arith.constant 0 : index
    %c0_8 = arith.constant 0 : index
    %4 = vector.load %arg4[%c0_6, %c0_7, %c0_8] : memref<4x16x1xf32, #tpu.memory_space<vmem>>, vector<4x16x1xf32>
    %5 = vector.broadcast %4 : vector<4x16x1xf32> to vector<4x16x16xf32>
    %6 = arith.addf %3, %5 : vector<4x16x16xf32>
    %c0_9 = arith.constant 0 : index
    %c0_10 = arith.constant 0 : index
    %c0_11 = arith.constant 0 : index
    %c0_12 = arith.constant 0 : index
    %7 = vector.load %arg5[%c0_9, %c0_10, %c0_11, %c0_12] : memref<1x4x16x16xf32, #tpu.memory_space<vmem>>, vector<1x4x16x16xf32>
    %8 = vector.shape_cast %7 : vector<1x4x16x16xf32> to vector<4x16x16xf32>
    %9 = vector.shape_cast %6 : vector<4x16x16xf32> to vector<1x4x16x16xf32>
    tpu.vector_store %arg5[%c0_9, %c0_10, %c0_11, %c0_12], %9 {strides = array<i32>} : memref<1x4x16x16xf32, #tpu.memory_space<vmem>>, vector<1x4x16x16xf32>,
    return
  }
  func.func @transform_0(%arg0: i32, %arg1: i32) -> (i32, i32, i32, i32) {
    %c0_i32 = arith.constant 0 : i32
    %c0_i32_0 = arith.constant 0 : i32
    %c0_i32_1 = arith.constant 0 : i32
    return %arg1, %arg0, %c0_i32, %c0_i32_0 : i32, i32, i32, i32
  }
  func.func @transform_1(%arg0: i32, %arg1: i32) -> (i32, i32, i32) {
    %c0_i32 = arith.constant 0 : i32
    %c0_i32_0 = arith.constant 0 : i32
    %c0_i32_1 = arith.constant 0 : i32
    return %arg0, %c0_i32, %c0_i32_0 : i32, i32, i32
  }
  func.func @transform_2(%arg0: i32, %arg1: i32) -> (i32, i32, i32) {
    %c0_i32 = arith.constant 0 : i32
    %c0_i32_0 = arith.constant 0 : i32
    %c0_i32_1 = arith.constant 0 : i32
    return %arg0, %c0_i32, %c0_i32_0 : i32, i32, i32
  }
  func.func @transform_3(%arg0: i32, %arg1: i32) -> (i32, i32, i32, i32) {
    %c0_i32 = arith.constant 0 : i32
    %c0_i32_0 = arith.constant 0 : i32
    %c0_i32_1 = arith.constant 0 : i32
    return %arg1, %arg0, %c0_i32, %c0_i32_0 : i32, i32, i32, i32
  }
}

</mosaic_0001>

<bundles_post_ra>
// kernel: tpu_custom_call.1
= control target key start
LH: loop header
LB: loop body
LE: loop exit
PB: predicated region body
PF: predicated region fallthrough
CT: control target
= control target key end

     0   :  { %8 = vsyncpa [#allocation3], 0  ;;  %s1369_s0 = inlined_call_operand.hbm [shape: f32[2,8,16,16], index: 0, kind: input, shape index: {}]   ;;  %s1370_s1 = inlined_call_operand.vmem [shape: f32[8,16,16], index: 1, kind: input, shape index: {}]   ;;  %s1371_s2 = inlined_call_operand.vmem [shape: f32[8,16,1], index: 2, kind: input, shape index: {}]   ;;  %s1372_s3 = inlined_call_operand.hbm [shape: f32[2,8,16,16], index: 3, kind: output, shape index: {}]  }
   0x1   :  { %10 = vsyncpa [#allocation3 + $0x1], 0 }
   0x2   :  { %11 = vsyncpa [#allocation4], 0 }
   0x3   :  { %13 = vsyncpa [#allocation4 + $0x1], 0  ;;  %s1127_s12 = smov 0   ;;  %s1129_s13 = smov 0  }
   0x4   :  { %s1131_s14 = smov 0   ;;  %s1133_s15 = smov 0  }
   0x5   :  { %s1135_s16 = smov 0   ;;  %s1137_s17 = smov 0  }
   0x6   :  { %s1139_s18 = smov 0   ;;  %s1141_s19 = smov 0  }
   0x7 LB: > { %s788_s20 = sadd.s32 4294967295, %s1098_s19   ;;  %s789_s21 = sadd.s32 4294967294, %s1098_s19   ;;  %s1098_s19 = sphi %s1141_s19, %s19_s19   ;;  %s1094_s18 = sphi %s1139_s18, %s1390_s18   ;;  %s1090_s17 = sphi %s1137_s17, %s1389_s17   ;;  %s1086_s16 = sphi %s1135_s16, %s1388_s16   ;;  %s1082_s15 = sphi %s1133_s15, %s1387_s15   ;;  %s1078_s14 = sphi %s1131_s14, %s1386_s14   ;;  %s1074_s13 = sphi %s1129_s13, %s1385_s13   ;;  %s1070_s12 = sphi %s1127_s12, %s1384_s12  }
   0x8   : > { %s28_s22 = sadd.s32 1, %s1090_s17  ;;  %s31_s23 = sadd.s32 1, %s1094_s18 }
   0x9   : > { %p29_p0 = scmp.ge.s32.totalorder %s28_s22, 2  ;;  %s40_s24 = sadd.s32 1, %s1078_s14 }
   0xa   : > { %p47_p1 = scmp.ne.s32.totalorder %s1078_s14, %s1074_s13  ;;  %p48_p2 = scmp.eq.s32.totalorder %s1098_s19, 0 }
   0xb   : > { %s1392_s22 = smov (%p29_p0, %s28_s22), 0  ;;  %s1394_s23 = smov (!%p29_p0, %s31_s23), %s1094_s18 }
   0xc   : > { %s35_s25 = ssub.s32 %s1090_s17, %s1392_s22  ;;  %p1180_p3 = por %p48_p2, %p47_p1 }
   0xd   : > { %p33_p4 = scmp.ge.s32.totalorder %s1394_s23, 2  ;;  %p53_p5 = scmp.ne.s32.totalorder %s1074_s13, %s1070_s12 }
   0xe   : > { %p54_p6 = scmp.eq.s32.totalorder %s788_s20, 0  ;;  %p131_p7 = scmp.eq.s32.totalorder %s788_s20, 3 }
   0xf   : > { %s1396_s23 = smov (%p33_p4, %s1394_s23), 0  ;;  %p137_p10 = scmp.eq.s32.totalorder %s789_s21, 3 }
  0x10   : > { %1376 = sst [smem:[#allocation8_spill]] %s1396_s23  ;;  %p1188_p8 = por %p54_p6, %p53_p5 }
  0x11   : > { %p1192_p9 = por %p131_p7, %p47_p1  ;;  %s36_s29 = ssub.s32 %s1094_s18, %s1396_s23 }
  0x12   : > { %s37_s30 = sor.u32 %s36_s29, %s35_s25  ;;  %p1198_p12 = por %p137_p10, %p53_p5 }
  0x13   : > { %s1378_s28 = scalar_select %p1192_p9, 1, 0 }
  0x14   : > { %p38_p11 = scmp.eq.s32.totalorder %s37_s30, 0  ;;  %p897_p13 = scmp.lt.s32.totalorder %s1098_s19, 4 }
  0x15   : > { %s1379_s4 = scalar_select %p1198_p12, 1, 0 }
  0x16   : > { %s157_s5 = sand.u32 1, %s1078_s14   ;;  %s821_s8 = sshll.u32 %s1094_s18, 3 }
  0x17   : > { %s1205_s6 = scalar_select %p38_p11, %s1078_s14, %s40_s24  }
  0x18   : > { %s792_s7 = sshll.u32 %s157_s5, 6  ;;  %s795_s9 = sshll.u32 %s1090_s17, 4 }
  0x19   : > { %s161_s10 = scalar_lea.vmem [#allocation2], %s792_s7  ;;  %s168_s20 = sadd.s32 %s821_s8, %s795_s9 }
  0x1a   : > { %s171_s11 = sshll.u32 %s161_s10, 4  ;;  %s796_s23 = sshll.u32 %s168_s20, 7  ;;  %s1209_s11 = int_to_ptr.vmem [resolvable:$true] %s171_s11 }
  0x1b   : > { %p1213_p0 = pnand %p897_p13, %p1180_p3  ;;  %s1220_s24 = scalar_lea.hbm %s1369_s0, %s796_s23 }
  0x1c   : > { %s1222_s30 = scalar_lea.sflag [#allocation3], %s157_s5  ;;  %s970_s7 = scalar_lea.hbm %s1220_s24, 1024 }
  0x1d   : > { %p971_p1 = scmp.ne.s32.totalorder %s1220_s24, %s970_s7  ;;  %p972_p2 = pneg %p1213_p0 }
  0x1e   : > { %s975_s9 = scalar_lea.hbm %s1369_s0, 4096  ;;  %p976_p5 = scmp.lt.u32.totalorder %s1220_s24, %s1369_s0 }
  0x1f   : > { %p973_p3 = pnand %p972_p2, %p971_p1  ;;  %p977_p6 = scmp.lt.u32.totalorder %s975_s9, %s970_s7 }
  0x20   : > { %p979_p10 = scmp.lt.u32.totalorder %s970_s7, %s1220_s24 }
  0x21   : > { %p974_p4 = pneg %p973_p3  ;;  %p978_p7 = por %p977_p6, %p976_p5 }
  0x23   : > { %p980_p11 = por %p979_p10, %p978_p7 }
  0x25   : > { %p981_p13 = pnand %p980_p11, %p974_p4 }
  0x27   : > { %984 = shalt.err (!%p981_p13)
}
  0x28   : > { %s985_s5 = scalar_lea.vmem %s1209_s11, 1024  ;;  %s1100_s20 = smov [#allocation2]  }
  0x29   : > { %p986_p1 = scmp.ne.s32.totalorder %s1209_s11, %s985_s5  ;;  %s990_s25 = sshll.u32 %s1100_s20, 4  ;;  %s991_s25 = int_to_ptr.vmem [resolvable:$false] %s990_s25 }
  0x2a   : > { %s992_s29 = scalar_lea.vmem %s991_s25, 2048  ;;  %p993_p9 = scmp.lt.s32.totalorder %s1209_s11, %s991_s25 }
  0x2b   : > { %p988_p3 = pnand %p986_p1, %p972_p2  ;;  %p994_p5 = scmp.lt.s32.totalorder %s992_s29, %s985_s5 }
  0x2d   : > { %p989_p12 = pneg %p988_p3  ;;  %p995_p6 = por %p994_p5, %p993_p9 }
  0x2f   : > { %p996_p7 = pnand %p995_p6, %p989_p12 }
  0x31   : > { %999 = shalt.err (!%p996_p7)
}
  0x32   : > { %s1101_s7 = smov 128   ;;  %s1102_s26 = smov 8  }
  0x33   : > { %892 = dma.hbm_to_vmem [thread:$0]  (!%p1213_p0), %s1220_s24, 1024, %s1209_s11, %s1222_s30, %s1101_s7, %s1101_s7, %s1102_s26  }
  0x34   : > { %p797_p2 = scmp.ge.s32.totalorder %s1098_s19, 1  ;;  %p199_p4 = scmp.lt.s32.totalorder %s1098_s19, 5 }
  0x36   : > { %p200_p10 = pnand %p797_p2, %p199_p4 }
  0x37   : > { %s1253_s8 = sand.u32 (!%p200_p10), 1, %s1074_s13  }
  0x38   : > { %203 = sbr.rel (%p200_p10) target bundleno = 307 (0x133), region = 32  ;;  %s798_s9 = sshll.u32 (!%p200_p10), %s1253_s8, 6 }
  0x39   : > { %s206_s23 = scalar_lea.sflag (!%p200_p10), [#allocation3], %s1253_s8  ;;  %s209_s10 = scalar_lea.vmem (!%p200_p10), [#allocation2], %s798_s9 }
  0x3f   : > { %1061 = dma.done.wait (%p1188_p8), %s206_s23, 1024  }
  0x40   : > { %1063 = vsyncadd (%p1188_p8), %s206_s23, 4294966272  ;;  %s800_s11 = sshll.u32 %s1086_s16, 2  ;;  %v1103_v0 = vmov 0   ;;  %vm324_vm0 = vcmask 130048   ;;  %v268_v1 = vld [vmem:[%s209_s10] sm:$0xff]  ;;  %v269_v2 = vld [vmem:[%s209_s10 + $0x8] sm:$0xff] }
  0x41   : > { %p246_p9 = scmp.lt.s32.totalorder %s800_s11, 7  ;;  %969 = vset.pattern.permute.xlu1 %v1103_v0  ;;  %968 = vset.pattern.permute.xlu0 %v1103_v0  ;;  %v270_v3 = vld [vmem:[%s209_s10 + $0x10] sm:$0xff]  ;;  %v869_v4 = vpack.c.bf16 %v269_v2, %v268_v1  ;;  %v271_v5 = vld [vmem:[%s209_s10 + $0x18] sm:$0xff]  ;;  %v272_v9 = vld [vmem:[%s209_s10 + $0x20] sm:$0xff]  ;;  %s824_s29 = sshll.u32 %s1086_s16, 3 }
  0x42   : > { %v873_v8 = vpack.c.bf16 %v271_v5, %v270_v3  ;;  %v273_v10 = vld [vmem:[%s209_s10 + $0x28] sm:$0xff]  ;;  %v274_v11 = vld [vmem:[%s209_s10 + $0x30] sm:$0xff]  ;;  %v275_v12 = vld [vmem:[%s209_s10 + $0x38] sm:$0xff]  ;;  %s817_s7 = sshll.u32 %s1082_s15, 4  ;;  %s243_s23 = scalar_lea.vmem [#allocation5], %s798_s9 }
  0x43   : > { %s1398_s11 = smov (!%p246_p9, %s800_s11), 7  ;;  %870 = vmatprep.subr.bf16.mxu0 %v869_v4  ;;  %v877_v14 = vpack.c.bf16 %v273_v10, %v272_v9  ;;  %v881_v15 = vpack.c.bf16 %v275_v12, %v274_v11  ;;  %s671_s26 = sadd.s32 %s824_s29, %s817_s7 }
  0x44   : > { %s822_s21 = sshll.u32 %s1398_s11, 4  ;;  %874 = vmatprep.subr.bf16.mxu1 %v873_v8  ;;  %872 = vmatpush3.bf16.msra.mxu0 %v869_v4  ;;  %s818_s10 = sshll.u32 %s671_s26, 7 }
  0x45   : > { %s1267_s5 = scalar_lea.vmem %s1370_s1, %s822_s21  ;;  %s1276_s25 = scalar_lea.vmem %s1371_s2, %s822_s21  ;;  %876 = vmatpush3.bf16.msra.mxu1 %v873_v8  ;;  %878 = vmatprep.subr.bf16.mxu0 %v877_v14 }
  0x46   : > { %v260_v6 = vld [vmem:[%s1267_s5] sm:$0xff]  ;;  %v262_v7 = vld [vmem:[%s1267_s5 + $0x10] sm:$0xff]  ;;  %v261_v13 = vld [vmem:[%s1267_s5 + $0x8] sm:$0xff]  ;;  %882 = vmatprep.subr.bf16.mxu1 %v881_v15  ;;  %s674_s11 = sshll.u32 %s243_s23, 4  ;;  %s1309_s9 = scalar_lea.hbm %s1372_s3, %s818_s10  ;;  %s1311_s11 = int_to_ptr.vmem [resolvable:$true] %s674_s11 }
  0x47   : > { %845 = vmatprep.mubr.msk.f32.mxu0 %vm324_vm0, %v260_v6  ;;  %852 = vmatprep.mubr.msk.f32.mxu1 %vm324_vm0, %v262_v7  ;;  %v263_v16 = vld [vmem:[%s1267_s5 + $0x18] sm:$0xff]  ;;  %v278_v17 = vld [vmem:[%s1276_s25 + $0x10] sm:$0xff]  ;;  %v264_v18 = vld [vmem:[%s1267_s5 + $0x20] sm:$0xff]  ;;  %s658_s21 = scalar_lea.sflag [#allocation4], %s1253_s8  ;;  %s1000_s24 = scalar_lea.vmem %s1311_s11, 1024 }
  0x48   : > { %846 = vmatmul.mubr.msk.f32.vlgmr.msra.gmra.mrb[0].mxu0 %vm324_vm0, %v261_v13  ;;  %v266_v19 = vld [vmem:[%s1267_s5 + $0x30] sm:$0xff]  ;;  %296 = vperm.xlu1 %969, %v278_v17   ;;  %v276_v20 = vld [vmem:[%s1276_s25] sm:$0xff]  ;;  %v265_v21 = vld [vmem:[%s1267_s5 + $0x28] sm:$0xff]  ;;  %p1001_p8 = scmp.ne.s32.totalorder %s1311_s11, %s1000_s24  ;;  %p1381_p12 = scmp.ne.s32.totalorder %s1378_s28, 0 }
  0x49   : > { %853 = vmatmul.mubr.msk.f32.vlgmr.msra.gmra.mrb[0].mxu1 %vm324_vm0, %v263_v16  ;;  %880 = vmatpush3.bf16.msra.mxu0 %v877_v14  ;;  %v279_v22 = vld [vmem:[%s1276_s25 + $0x18] sm:$0xff]  ;;  %v277_v24 = vld [vmem:[%s1276_s25 + $0x8] sm:$0xff]  ;;  %v280_v26 = vld [vmem:[%s1276_s25 + $0x20] sm:$0xff]  ;;  %s1104_s30 = smov [#allocation5]  }
  0x4a   : > { %884 = vmatpush3.bf16.msra.mxu1 %v881_v15  ;;  %859 = vmatprep.mubr.msk.f32.mxu0 %vm324_vm0, %v264_v18  ;;  %v267_v23 = vld [vmem:[%s1267_s5 + $0x38] sm:$0xff]  ;;  %v281_v25 = vld [vmem:[%s1276_s25 + $0x28] sm:$0xff]  ;;  %v282_v28 = vld [vmem:[%s1276_s25 + $0x30] sm:$0xff]  ;;  %p1002_p0 = pnand %p1001_p8, %p1381_p12  ;;  %s1004_s5 = sshll.u32 %s1104_s30, 4  ;;  %s1005_s5 = int_to_ptr.vmem [resolvable:$false] %s1004_s5 }
  0x4b   : > { %866 = vmatprep.mubr.msk.f32.mxu1 %vm324_vm0, %v266_v19  ;;  %286 = vperm.xlu0 %968, %v276_v20   ;;  %v283_v27 = vld [vmem:[%s1276_s25 + $0x38] sm:$0xff]  ;;  %s1006_s27 = scalar_lea.vmem %s1005_s5, 2048  ;;  %p1007_p13 = scmp.lt.s32.totalorder %s1311_s11, %s1005_s5 }
  0x4c   : > { %860 = vmatmul.mubr.msk.f32.vlgmr.msra.gmra.mrb[2].mxu0 %vm324_vm0, %v265_v21  ;;  %301 = vperm.xlu1 %969, %v279_v22   ;;  %p1003_p11 = pneg %p1002_p0  ;;  %p1008_p1 = scmp.lt.s32.totalorder %s1006_s27, %s1000_s24 }
  0x4d   : > { %867 = vmatmul.mubr.msk.f32.vlgmr.msra.gmra.mrb[2].mxu1 %vm324_vm0, %v267_v23 }
  0x4e   : > { %p1009_p3 = por %p1008_p1, %p1007_p13 }
  0x4f   : > { %291 = vperm.xlu0 %968, %v277_v24  }
  0x50   : > { %311 = vperm.xlu1 %969, %v281_v25   ;;  %p1010_p5 = pnand %p1009_p3, %p1003_p11 }
  0x53   : > { %306 = vperm.xlu0 %968, %v280_v26  }
  0x54   : > { %321 = vperm.xlu1 %969, %v283_v27  }
  0x57   : > { %316 = vperm.xlu0 %968, %v282_v28  }
  0xc7   : > { %v297_v29 = vpop.permute.xlu1 %296 }
  0xca   : > { %v287_v30 = vpop.permute.xlu0 %286 }
  0xcb   : > { %v302_v31 = vpop.permute.xlu1 %301 }
  0xce   : > { %v292_v32 = vpop.permute.xlu0 %291 }
  0xcf   : > { %v312_v33 = vpop.permute.xlu1 %311 }
  0xd2   : > { %v307_v34 = vpop.permute.xlu0 %306 }
  0xd3   : > { %v322_v43 = vpop.permute.xlu1 %321 }
  0xd6   : > { %v317_v48 = vpop.permute.xlu0 %316 }
 0x11b   : > { %v847_v35 = vpop.f32.mrb[0].mxu0 }
 0x11c   : > { %v403_v36 = vadd.f32 %v847_v35, %v292_v32  ;;  %v854_v37 = vpop.f32.mrb[0].mxu1  ;;  %v397_v38 = vpop.f32.mrb[1].mxu0 }
 0x11d   : > { %v484_v39 = vadd.f32 %v854_v37, %v302_v31  ;;  %v398_v40 = vadd.f32 %v397_v38, %v287_v30  ;;  %v478_v41 = vpop.f32.mrb[1].mxu1 }
 0x11e   : > { %650 = vst.msk [vmem:[%s243_s23 + $0x8] sm:$0xff] %vm324_vm0, %v403_v36  ;;  %v479_v42 = vadd.f32 %v478_v41, %v297_v29 }
 0x11f   : > { %652 = vst.msk [vmem:[%s243_s23 + $0x18] sm:$0xff] %vm324_vm0, %v484_v39  ;;  %649 = vst.msk [vmem:[%s243_s23] sm:$0xff] %vm324_vm0, %v398_v40  ;;  %v861_v44 = vpop.f32.mrb[2].mxu0 }
 0x120   : > { %651 = vst.msk [vmem:[%s243_s23 + $0x10] sm:$0xff] %vm324_vm0, %v479_v42  ;;  %v565_v45 = vadd.f32 %v861_v44, %v312_v33  ;;  %v868_v46 = vpop.f32.mrb[2].mxu1  ;;  %v559_v47 = vpop.f32.mrb[3].mxu0 }
 0x121   : > { %v646_v49 = vadd.f32 %v868_v46, %v322_v43  ;;  %v560_v50 = vadd.f32 %v559_v47, %v307_v34  ;;  %v640_v51 = vpop.f32.mrb[3].mxu1 }
 0x122   : > { %654 = vst.msk [vmem:[%s243_s23 + $0x28] sm:$0xff] %vm324_vm0, %v565_v45  ;;  %v641_v52 = vadd.f32 %v640_v51, %v317_v48 }
 0x123   : > { %656 = vst.msk [vmem:[%s243_s23 + $0x38] sm:$0xff] %vm324_vm0, %v646_v49  ;;  %653 = vst.msk [vmem:[%s243_s23 + $0x20] sm:$0xff] %vm324_vm0, %v560_v50 }
 0x124   : > { %655 = vst.msk [vmem:[%s243_s23 + $0x30] sm:$0xff] %vm324_vm0, %v641_v52 }
 0x125   : > { %1013 = shalt.err (!%p1010_p5)
}
 0x126   : > { %s1014_s20 = scalar_lea.hbm %s1309_s9, 1024  ;;  %s1018_s7 = scalar_lea.hbm %s1372_s3, 4096 }
 0x127   : > { %p1015_p6 = scmp.ne.s32.totalorder %s1309_s9, %s1014_s20  ;;  %p1019_p4 = scmp.lt.u32.totalorder %s1309_s9, %s1372_s3 }
 0x128   : > { %p1020_p10 = scmp.lt.u32.totalorder %s1018_s7, %s1014_s20  ;;  %p1022_p8 = scmp.lt.u32.totalorder %s1014_s20, %s1309_s9 }
 0x129   : > { %p1016_p7 = pnand %p1015_p6, %p1381_p12 }
 0x12a   : > { %p1021_p9 = por %p1020_p10, %p1019_p4 }
 0x12b   : > { %p1017_p2 = pneg %p1016_p7 }
 0x12c   : > { %p1023_p0 = por %p1022_p8, %p1021_p9 }
 0x12e   : > { %p1024_p11 = pnand %p1023_p0, %p1017_p2 }
 0x130   : > { %1027 = shalt.err (!%p1024_p11)
}
 0x131   : > { %s1105_s10 = smov 128   ;;  %s1106_s15 = smov 8  }
 0x132   : > { %887 = dma.vmem_to_hbm [thread:$0]  (%p1381_p12), %s1311_s11, 1024, %s1309_s9, %s658_s21, %s1105_s10, %s1105_s10, %s1106_s15  }
 0x133 PF: > { %p898_p13 = scmp.ge.s32.totalorder %s1098_s19, 2  ;;  %s689_s16 = sand.u32 1, %s1070_s12  }
 0x134   : > { %p1382_p1 = scmp.ne.s32.totalorder %s1379_s4, 0  ;;  %s690_s24 = scalar_lea.sflag [#allocation4], %s689_s16 }
 0x136   : > { %p894_p3 = pnand %p898_p13, %p1382_p1 }
 0x138   : > { %1065 = dma.done.wait (!%p894_p3), %s690_s24, 1024  }
 0x139   : > { %1067 = vsyncadd (!%p894_p3), %s690_s24, 4294966272  ;;  %s19_s19 = sadd.s32 1, %s1098_s19   ;;  %s1383_s28 = sld [smem:[#allocation8_spill]] }
 0x13a   : > { %p16_p5 = scmp.ge.s32.totalorder %s19_s19, 6   ;;  %s1384_s12 = smov %s1074_s13 }
 0x13b   : > { %s1385_s13 = smov %s1078_s14  ;;  %s1386_s14 = smov %s1205_s6 }
 0x13c   : > { %s1387_s15 = smov %s1090_s17  ;;  %s1388_s16 = smov %s1094_s18 }
 0x13d   : > { %s1389_s17 = smov %s1392_s22  ;;  %18 = sbr.rel (!%p16_p5) target bundleno = 7 (0x7), region = 83 }
 0x13f   : > { %s1390_s18 = smov %s1383_s28 }
 0x144   :  { %695 = vsyncpa [#allocation3], 1 }
 0x145   :  { %697 = vsyncpa [#allocation3 + $0x1], 1 }
 0x146   :  { %698 = vsyncpa [#allocation4], 1 }
 0x147   :  { %700 = vsyncpa [#allocation4 + $0x1], 1 }

</bundles_post_ra>
